<compile_context>
chip_gen: v7x
topology: tpu7x:2x2x1
jax: 0.10.0
libtpu: 0.0.40
codegen_flags: <defaults>
</compile_context>

<pallas_src>
import jax
import jax.numpy as jnp
from jax.experimental import pallas as pl
from jax.experimental.pallas import tpu as pltpu  # noqa: F401  (TPU backend)


ROW_PAD = 8        # one full sublane group
COUT_PAD = 768     # 672 -> next multiple of 128 (lane-dense output)


def conv1x1_hardsigmoid_kernel(x_ref, w_ref, b_ref, o_ref):
    # MXU matmul: [rows_pad, C_in](bf16) @ [C_in, C_out_pad](bf16) -> f32 acc.
    x_bf16 = x_ref[...].astype(jnp.bfloat16)
    y = jnp.dot(x_bf16, w_ref[...], preferred_element_type=jnp.float32)
    y = y + b_ref[...]                               # bias broadcast over rows (f32)
    # Hardsigmoid: clip(x/6 + 1/2, 0, 1)  (== relu6(x+3)/6), f32 epilogue.
    y = jnp.clip(y * (1.0 / 6.0) + 0.5, 0.0, 1.0)
    o_ref[...] = y.astype(o_ref.dtype)


def prepare_conv_params(weight, bias, c_out_pad=COUT_PAD):
    """One-time parameter preparation (outside the per-call traced path).

    weight: [C_out, C_in] f32  ->  [C_in, c_out_pad] bf16 (transposed, zero-padded)
    bias  : [C_out]       f32  ->  [1, c_out_pad]    f32  (zero-padded tail)
    """
    c_out, c_in = weight.shape
    w_t = jnp.transpose(weight).astype(jnp.bfloat16)             # [C_in, C_out]
    w_padded = jnp.zeros((c_in, c_out_pad), jnp.bfloat16).at[:, :c_out].set(w_t)
    b_padded = jnp.zeros((1, c_out_pad), jnp.float32).at[0, :c_out].set(
        bias.astype(jnp.float32))
    return w_padded, b_padded


def conv1x1_hardsigmoid(x_nchw, w_padded, b_padded, c_out):
    """x_nchw: [N, C_in, H, W]; w_padded: [C_in, C_out_pad] bf16; b_padded: [1, C_out_pad]."""
    N, C_in, H, W = x_nchw.shape
    c_out_pad = w_padded.shape[1]

    rows = N * H * W
    rows_pad = max(ROW_PAD, ((rows + ROW_PAD - 1) // ROW_PAD) * ROW_PAD)

    # NCHW, kernel=1x1, stride=1 -> each spatial position is an independent row.
    x_rows = jnp.transpose(x_nchw, (0, 2, 3, 1)).reshape(rows, C_in)
    x_pad = jnp.zeros((rows_pad, C_in), jnp.float32).at[:rows, :].set(
        x_rows.astype(jnp.float32))

    out_pad = pl.pallas_call(
        conv1x1_hardsigmoid_kernel,
        out_shape=jax.ShapeDtypeStruct((rows_pad, c_out_pad), jnp.float32),
        in_specs=[
            pl.BlockSpec((rows_pad, C_in), lambda: (0, 0)),
            pl.BlockSpec((C_in, c_out_pad), lambda: (0, 0)),
            pl.BlockSpec((1, c_out_pad), lambda: (0, 0)),
        ],
        out_specs=pl.BlockSpec((rows_pad, c_out_pad), lambda: (0, 0)),
    )(x_pad, w_padded, b_padded)

    # Slice away row / lane padding, then rows -> NHWC -> NCHW.
    out_rows = out_pad[:rows, :c_out]
    out = out_rows.reshape(N, H, W, c_out)
    return jnp.transpose(out, (0, 3, 1, 2)).astype(x_nchw.dtype)


if __name__ == "__main__":
    key = jax.random.PRNGKey(0)
    kx, kw, kb = jax.random.split(key, 3)

    N, C_in, C_out, H, W = 1, 168, 672, 1, 1

    # Deterministic synthetic parameters (module-defined shapes, not a checkpoint).
    x = jax.random.normal(kx, (N, C_in, H, W), dtype=jnp.float32)
    weight = jax.random.normal(kw, (C_out, C_in), dtype=jnp.float32) * 0.05
    bias = jax.random.normal(kb, (C_out,), dtype=jnp.float32) * 0.05

    # One-time prep (transpose + pad + bf16 cast) outside the per-call path.
    w_padded, b_padded = prepare_conv_params(weight, bias)
    w_padded = jax.block_until_ready(w_padded)
    b_padded = jax.block_until_ready(b_padded)

    out = conv1x1_hardsigmoid(x, w_padded, b_padded, C_out)
    out = jax.block_until_ready(out)

    # Reference in plain JAX (full-f32 math: 1x1 conv == matmul, then hardsigmoid).
    ref = jnp.einsum("nchw,oc->nohw", x, weight) + bias.reshape(1, C_out, 1, 1)
    ref = jnp.clip(ref / 6.0 + 0.5, 0.0, 1.0)

    assert out.shape == (N, C_out, H, W)
    # Loose tolerance vs. f32 reference (weights/activations are bf16 inside the
    # kernel; error bound here is ~1e-3 before the /6 and saturating clip).
    assert jnp.allclose(out, ref, atol=1e-2, rtol=1e-2)

    # Tighter check against a bf16-matched reference (same quantization as kernel).
    ref_bf16 = jnp.einsum(
        "nchw,oc->nohw",
        x.astype(jnp.bfloat16).astype(jnp.float32),
        weight.astype(jnp.bfloat16).astype(jnp.float32),
    ) + bias.reshape(1, C_out, 1, 1)
    ref_bf16 = jnp.clip(ref_bf16 / 6.0 + 0.5, 0.0, 1.0)
    assert jnp.allclose(out, ref_bf16, atol=1e-3, rtol=1e-3)

    print("KERNEL_OK")
</pallas_src>

<mosaic_0001>
module attributes {stable_mosaic.version = 11 : i64} {
  func.func @conv1x1_hardsigmoid_kernel(%arg0: memref<8x168xf32, #tpu.memory_space<vmem>>, %arg1: memref<168x768xbf16, #tpu.memory_space<vmem>>, %arg2: memref<1x768xf32, #tpu.memory_space<vmem>>, %arg3: memref<8x768xf32, #tpu.memory_space<vmem>>) attributes {dimension_semantics = [], scalar_prefetch = 0 : i64, scratch_operands = 0 : i64, tpu.core_type = #tpu.core_type<tc>} {
    %c0 = arith.constant 0 : index
    %c0_0 = arith.constant 0 : index
    %0 = vector.load %arg0[%c0, %c0_0] : memref<8x168xf32, #tpu.memory_space<vmem>>, vector<8x168xf32>
    %1 = arith.truncf %0 : vector<8x168xf32> to vector<8x168xbf16>
    %c0_1 = arith.constant 0 : index
    %c0_2 = arith.constant 0 : index
    %2 = vector.load %arg1[%c0_1, %c0_2] : memref<168x768xbf16, #tpu.memory_space<vmem>>, vector<168x768xbf16>
    %cst = arith.constant dense<0.000000e+00> : vector<8x768xf32>
    %3 = tpu.matmul %1, %2, %cst {dimension_numbers = #tpu.dot_dimension_numbers<[1], [0], [0], [1], [0, 0, 1, 1], [], []>} : vector<8x168xbf16>, vector<168x768xbf16>, vector<8x768xf32> -> vector<8x768xf32>
    %c0_3 = arith.constant 0 : index
    %c0_4 = arith.constant 0 : index
    %4 = vector.load %arg2[%c0_3, %c0_4] : memref<1x768xf32, #tpu.memory_space<vmem>>, vector<1x768xf32>
    %5 = vector.broadcast %4 : vector<1x768xf32> to vector<8x768xf32>
    %6 = arith.addf %3, %5 : vector<8x768xf32>
    %cst_5 = arith.constant 0.166666672 : f32
    %7 = vector.broadcast %cst_5 : f32 to vector<8x768xf32>
    %8 = arith.mulf %6, %7 : vector<8x768xf32>
    %cst_6 = arith.constant 5.000000e-01 : f32
    %9 = vector.broadcast %cst_6 : f32 to vector<8x768xf32>
    %10 = arith.addf %8, %9 : vector<8x768xf32>
    %cst_7 = arith.constant 0.000000e+00 : f32
    %cst_8 = arith.constant 1.000000e+00 : f32
    %11 = vector.broadcast %cst_7 : f32 to vector<8x768xf32>
    %12 = arith.maximumf %11, %10 : vector<8x768xf32>
    %13 = vector.broadcast %cst_8 : f32 to vector<8x768xf32>
    %14 = arith.minimumf %13, %12 : vector<8x768xf32>
    %c0_9 = arith.constant 0 : index
    %c0_10 = arith.constant 0 : index
    %15 = vector.load %arg3[%c0_9, %c0_10] : memref<8x768xf32, #tpu.memory_space<vmem>>, vector<8x768xf32>
    tpu.vector_store %arg3[%c0_9, %c0_10], %14 {strides = array<i32>} : memref<8x768xf32, #tpu.memory_space<vmem>>, vector<8x768xf32>,
    return
  }
}

</mosaic_0001>

<bundles_post_ra>
// kernel: tpu_custom_call.1
= control target key start
LH: loop header
LB: loop body
LE: loop exit
PB: predicated region body
PF: predicated region fallthrough
CT: control target
= control target key end

     0   :  { %8 = vsyncpa [#allocation3], 0  ;;  %s983_s0 = inlined_call_operand.hbm [shape: f32[8,168], index: 0, kind: input, shape index: {}]   ;;  %s984_s1 = inlined_call_operand.hbm [shape: bf16[168,768], index: 1, kind: input, shape index: {}]   ;;  %s985_s2 = inlined_call_operand.vmem [shape: f32[1,768], index: 2, kind: input, shape index: {}]   ;;  %s986_s3 = inlined_call_operand.hbm [shape: f32[8,768], index: 3, kind: output, shape index: {}]  }
   0x1   :  { %9 = vsyncpa [#allocation6], 0 }
   0x2   :  { %10 = vsyncpa [#allocation4], 0  ;;  %s893_s12 = smov [#allocation2]   ;;  %s894_s14 = smov [#allocation5]  }
   0x3   :  { %s17_s13 = sshll.u32 %s893_s12, 4  ;;  %s26_s15 = sshll.u32 %s894_s14, 4  ;;  %s18_s13 = int_to_ptr.vmem [resolvable:$true] %s17_s13  ;;  %s918_s15 = int_to_ptr.vmem [resolvable:$true] %s26_s15 }
   0x4   :  { %s821_s18 = scalar_lea.hbm %s983_s0, 256 }
   0x5   :  { %p822_p0 = scmp.ne.s32.totalorder %s983_s0, %s821_s18  ;;  %p825_p1 = scmp.lt.u32.totalorder %s821_s18, %s983_s0 }
   0x7   :  { %p827_p2 = pnand %p825_p1, %p822_p0 }
   0x9   :  { %830 = shalt.err (!%p827_p2)
}
   0xa   :  { %s831_s23 = scalar_lea.vmem %s18_s13, 256  ;;  %p836_p4 = scmp.lt.s32.totalorder %s18_s13, %s18_s13 }
   0xb   :  { %p832_p3 = scmp.ne.s32.totalorder %s18_s13, %s831_s23  ;;  %p837_p5 = scmp.lt.s32.totalorder %s831_s23, %s831_s23 }
   0xd   :  { %p838_p6 = por %p837_p5, %p836_p4 }
   0xf   :  { %p839_p7 = pnand %p838_p6, %p832_p3 }
  0x11   :  { %842 = shalt.err (!%p839_p7)
}
  0x12   :  { %20 = dma.hbm_to_vmem [thread:$0]  %s983_s0, 256, %s18_s13, [#allocation3]  }
  0x13   :  { %s843_s28 = scalar_lea.hbm %s984_s1, 8064 }
  0x14   :  { %p844_p8 = scmp.ne.s32.totalorder %s984_s1, %s843_s28  ;;  %p847_p9 = scmp.lt.u32.totalorder %s843_s28, %s984_s1 }
  0x16   :  { %p849_p10 = pnand %p847_p9, %p844_p8 }
  0x18   :  { %852 = shalt.err (!%p849_p10)
}
  0x19   :  { %s853_s6 = scalar_lea.vmem %s918_s15, 8064  ;;  %p858_p12 = scmp.lt.s32.totalorder %s918_s15, %s918_s15 }
  0x1a   :  { %p854_p11 = scmp.ne.s32.totalorder %s918_s15, %s853_s6  ;;  %p859_p13 = scmp.lt.s32.totalorder %s853_s6, %s853_s6 }
  0x1c   :  { %p860_p0 = por %p859_p13, %p858_p12 }
  0x1e   :  { %p861_p1 = pnand %p860_p0, %p854_p11 }
  0x20   :  { %864 = shalt.err (!%p861_p1)
}
  0x21   :  { %s895_s0 = smov 384   ;;  %s896_s7 = smov 24  }
  0x22   :  { %32 = dma.hbm_to_vmem [thread:$0]  %s984_s1, 8064, %s918_s15, [#allocation6], %s895_s0, %s895_s0, %s896_s7  }
  0x23   :  { %887 = dma.done.wait [#allocation3], 256  }
  0x24   :  { %888 = vsyncadd [#allocation3], 4294967040 }
  0x25   :  { %889 = dma.done.wait [#allocation6], 8064  }
  0x26   :  { %890 = vsyncadd [#allocation6], 4294959232  ;;  %v725_v0 = vld [vmem:[#allocation5 + $0x4] ss:$24 sps:$4 sm:$0xff]   ;;  %v727_v1 = vld [vmem:[#allocation5] ss:$24 sps:$4 sm:$0xff]  }
  0x27   :  { %479 = vmatprep.subr.bf16.mxu0 %v725_v0  ;;  %v728_v2 = vld [vmem:[#allocation5 + $0x34] ss:$24 sps:$4 sm:$0xff]   ;;  %v730_v3 = vld [vmem:[#allocation5 + $0x30] ss:$24 sps:$4 sm:$0xff]   ;;  %v731_v4 = vld [vmem:[#allocation5 + $0x64] ss:$24 sps:$4 sm:$0xff]  }
  0x28   :  { %480 = vmatpush1.bf16.msra.mxu0 %v727_v1  ;;  %v733_v5 = vld [vmem:[#allocation5 + $0x60] ss:$24 sps:$4 sm:$0xff]   ;;  %v734_v6 = vld [vmem:[#allocation5 + $0x94] ss:$24 sps:$4 sm:$0xff]   ;;  %v736_v7 = vld [vmem:[#allocation5 + $0x90] ss:$24 sps:$4 sm:$0xff]  }
  0x29   :  { %481 = vmatprep.subr.bf16.mxu0 %v728_v2  ;;  %v737_v8 = vld [vmem:[#allocation5 + $0xc4] ss:$24 sps:$4 sm:$0xff]   ;;  %v759_v10 = vld [vmem:[#allocation5 + $0x8] ss:$24 sps:$4 sm:$0xff]   ;;  %vm456_vm0 = vcmask 326656   ;;  %vm460_vm1 = vcmask 1043456  }
  0x2a   :  { %v757_v9 = vld [vmem:[#allocation5 + $0xc] ss:$24 sps:$4 sm:$0xff]   ;;  %v739_v11 = vld [vmem:[#allocation5 + $0xc0] ss:$24 sps:$4 sm:$0xff]   ;;  %v763_v15 = vld [vmem:[#allocation5 + $0x3c] ss:$24 sps:$4 sm:$0xff]  }
  0x2b   :  { %v43_v12 = vld [vmem:[#allocation2 + $0x8] sm:$0xff]  ;;  %v740_v13 = vld [vmem:[#allocation5 + $0xf4] ss:$24 sps:$4 sm:$0xff]   ;;  %520 = vmatprep.subr.bf16.mxu1 %v757_v9  ;;  %v742_v17 = vld [vmem:[#allocation5 + $0xf0] ss:$24 sps:$4 sm:$0xff]  }
  0x2c   :  { %482 = vmatpush1.bf16.msra.mxu0 %v730_v3  ;;  %v949_v14 = vpack.c.bf16 %v43_v12, %v43_v12  ;;  %521 = vmatpush1.bf16.msra.mxu1 %v759_v10  ;;  %v765_v16 = vld [vmem:[#allocation5 + $0x38] ss:$24 sps:$4 sm:$0xff]   ;;  %v743_v18 = vld [vmem:[#allocation5 + $0x124] ss:$24 sps:$4 sm:$0xff]   ;;  %v771_v20 = vld [vmem:[#allocation5 + $0x68] ss:$24 sps:$4 sm:$0xff]   ;;  %v111_v12 = vlaneseq }
  0x2d   :  { %483 = vmatprep.subr.bf16.mxu0 %v731_v4  ;;  %522 = vmatprep.subr.bf16.mxu1 %v763_v15  ;;  %v769_v19 = vld [vmem:[#allocation5 + $0x6c] ss:$24 sps:$4 sm:$0xff]   ;;  %v745_v21 = vld [vmem:[#allocation5 + $0x120] ss:$24 sps:$4 sm:$0xff]   ;;  %v775_v22 = vld [vmem:[#allocation5 + $0x9c] ss:$24 sps:$4 sm:$0xff]  }
  0x2e   :  { %715 = vmatprep.mubr.msk.bf16.mxu0 %vm456_vm0, %v949_v14  ;;  %717 = vmatprep.mubr.msk.bf16.mxu1 %vm456_vm0, %v949_v14  ;;  %v746_v23 = vld [vmem:[#allocation5 + $0x154] ss:$24 sps:$4 sm:$0xff]   ;;  %v777_v24 = vld [vmem:[#allocation5 + $0x98] ss:$24 sps:$4 sm:$0xff]   ;;  %v749_v27 = vld [vmem:[#allocation5 + $0x184] ss:$24 sps:$4 sm:$0xff]  }
  0x2f   :  { %v781_v25 = vld [vmem:[#allocation5 + $0xcc] ss:$24 sps:$4 sm:$0xff]   ;;  %v748_v26 = vld [vmem:[#allocation5 + $0x150] ss:$24 sps:$4 sm:$0xff]   ;;  %v787_v29 = vld [vmem:[#allocation5 + $0xfc] ss:$24 sps:$4 sm:$0xff]  }
  0x30   :  { %484 = vmatpush1.bf16.msra.mxu0 %v733_v5  ;;  %523 = vmatpush1.bf16.msra.mxu1 %v765_v16  ;;  %v783_v28 = vld [vmem:[#allocation5 + $0xc8] ss:$24 sps:$4 sm:$0xff]   ;;  %v752_v31 = vld [vmem:[#allocation5 + $0x1b4] ss:$24 sps:$4 sm:$0xff]   ;;  %v789_v33 = vld [vmem:[#allocation5 + $0xf8] ss:$24 sps:$4 sm:$0xff]  }
  0x31   :  { %485 = vmatprep.subr.bf16.mxu0 %v734_v6  ;;  %524 = vmatprep.subr.bf16.mxu1 %v769_v19  ;;  %v751_v30 = vld [vmem:[#allocation5 + $0x180] ss:$24 sps:$4 sm:$0xff]   ;;  %v793_v34 = vld [vmem:[#allocation5 + $0x12c] ss:$24 sps:$4 sm:$0xff]   ;;  %v754_v35 = vld [vmem:[#allocation5 + $0x1b0] ss:$24 sps:$4 sm:$0xff]  }
  0x32   :  { %v106_v32 = vld [vmem:[#allocation5 + $0x1e0] sm:$0xff]  ;;  %v799_v39 = vld [vmem:[#allocation5 + $0x15c] ss:$24 sps:$4 sm:$0xff]   ;;  %v801_v43 = vld [vmem:[#allocation5 + $0x158] ss:$24 sps:$4 sm:$0xff]  }
  0x33   :  { %v709_v36 = vcombine.high %v106_v32, %v106_v32  ;;  %v708_v37 = vcombine.low %v106_v32, %v106_v32  ;;  %v795_v38 = vld [vmem:[#allocation5 + $0x128] ss:$24 sps:$4 sm:$0xff]   ;;  %v42_v40 = vld [vmem:[#allocation2] sm:$0xff]  ;;  %v805_v45 = vld [vmem:[#allocation5 + $0x18c] ss:$24 sps:$4 sm:$0xff]  }
  0x34   :  { %486 = vmatpush1.bf16.msra.mxu0 %v736_v7  ;;  %525 = vmatpush1.bf16.msra.mxu1 %v771_v20  ;;  %v762_v42 = vld [vmem:[#allocation5 + $0x14] ss:$24 sps:$4 sm:$0xff]   ;;  %v957_v44 = vpack.c.bf16 %v42_v40, %v42_v40  ;;  %v760_v46 = vld [vmem:[#allocation5 + $0x10] ss:$24 sps:$4 sm:$0xff]   ;;  %v768_v47 = vld [vmem:[#allocation5 + $0x44] ss:$24 sps:$4 sm:$0xff]  }
  0x35   :  { %487 = vmatprep.subr.bf16.mxu0 %v737_v8  ;;  %526 = vmatprep.subr.bf16.mxu1 %v775_v22  ;;  %v462_v41 = vsel %vm460_vm1, %v708_v37, 0  ;;  %v807_v48 = vld [vmem:[#allocation5 + $0x188] ss:$24 sps:$4 sm:$0xff]   ;;  %v811_v49 = vld [vmem:[#allocation5 + $0x1bc] ss:$24 sps:$4 sm:$0xff]  }
  0x36   :  { %v766_v50 = vld [vmem:[#allocation5 + $0x40] ss:$24 sps:$4 sm:$0xff]   ;;  %v107_v51 = vld [vmem:[#allocation5 + $0x1e8] sm:$0xff]  ;;  %v780_v57 = vld [vmem:[#allocation5 + $0xa4] ss:$24 sps:$4 sm:$0xff]  }
  0x37   :  { %v774_v52 = vld [vmem:[#allocation5 + $0x74] ss:$24 sps:$4 sm:$0xff]   ;;  %v813_v53 = vld [vmem:[#allocation5 + $0x1b8] ss:$24 sps:$4 sm:$0xff]   ;;  %v711_v54 = vcombine.high %v107_v51, %v107_v51  ;;  %v710_v55 = vcombine.low %v107_v51, %v107_v51  ;;  %v792_v62 = vld [vmem:[#allocation5 + $0x104] ss:$24 sps:$4 sm:$0xff]  }
  0x38   :  { %488 = vmatpush1.bf16.msra.mxu0 %v739_v11  ;;  %527 = vmatpush1.bf16.msra.mxu1 %v777_v24  ;;  %v772_v56 = vld [vmem:[#allocation5 + $0x70] ss:$24 sps:$4 sm:$0xff]   ;;  %v778_v59 = vld [vmem:[#allocation5 + $0xa0] ss:$24 sps:$4 sm:$0xff]   ;;  %v786_v60 = vld [vmem:[#allocation5 + $0xd4] ss:$24 sps:$4 sm:$0xff]  }
  0x39   :  { %489 = vmatprep.subr.bf16.mxu0 %v740_v13  ;;  %528 = vmatprep.subr.bf16.mxu1 %v781_v25  ;;  %v468_v58 = vsel %vm460_vm1, %v710_v55, 0  ;;  %v784_v61 = vld [vmem:[#allocation5 + $0xd0] ss:$24 sps:$4 sm:$0xff]   ;;  %v790_v63 = vld [vmem:[#allocation5 + $0x100] ss:$24 sps:$4 sm:$0xff]   ;;  %v112_v13 = vshrl.u32 %v111_v12, 7 }
  0x3a   :  { %v798_v0 = vld [vmem:[#allocation5 + $0x134] ss:$24 sps:$4 sm:$0xff]   ;;  %v796_v1 = vld [vmem:[#allocation5 + $0x130] ss:$24 sps:$4 sm:$0xff]   ;;  %v804_v2 = vld [vmem:[#allocation5 + $0x164] ss:$24 sps:$4 sm:$0xff]  }
  0x3b   :  { %v802_v3 = vld [vmem:[#allocation5 + $0x160] ss:$24 sps:$4 sm:$0xff]   ;;  %v810_v4 = vld [vmem:[#allocation5 + $0x194] ss:$24 sps:$4 sm:$0xff]   ;;  %v808_v5 = vld [vmem:[#allocation5 + $0x190] ss:$24 sps:$4 sm:$0xff]  }
  0x3c   :  { %490 = vmatpush1.bf16.msra.mxu0 %v742_v17  ;;  %529 = vmatpush1.bf16.msra.mxu1 %v783_v28  ;;  %v816_v6 = vld [vmem:[#allocation5 + $0x1c4] ss:$24 sps:$4 sm:$0xff]   ;;  %v108_v7 = vld [vmem:[#allocation5 + $0x1f0] sm:$0xff]  ;;  %v814_v8 = vld [vmem:[#allocation5 + $0x1c0] ss:$24 sps:$4 sm:$0xff]   ;;  %v117_v16 = vsub.s32 1, %v112_v13 }
  0x3d   :  { %491 = vmatprep.subr.bf16.mxu0 %v743_v18  ;;  %530 = vmatprep.subr.bf16.mxu1 %v787_v29  ;;  %v713_v9 = vcombine.high %v108_v7, %v108_v7  ;;  %v712_v10 = vcombine.low %v108_v7, %v108_v7  ;;  %v109_v15 = vld [vmem:[%s985_s2] sm:$0x3f]  ;;  %v125_v32 = vsub.s32 3, %v112_v13  ;;  %v129_v51 = vsub.s32 4, %v112_v13  ;;  %s897_s2 = smov [#allocation7]  }
  0x3e   :  { %v118_v18 = vrot.slane %v109_v15, %v117_v16  ;;  %s638_s11 = sshll.u32 %s897_s2, 4  ;;  %s639_s11 = int_to_ptr.vmem [resolvable:$true] %s638_s11 }
  0x3f   :  { %v474_v11 = vsel %vm460_vm1, %v712_v10, 0  ;;  %s865_s12 = scalar_lea.vmem %s639_s11, 768  ;;  %p870_p3 = scmp.lt.s32.totalorder %s639_s11, %s639_s11 }
  0x40   :  { %492 = vmatpush1.bf16.msra.mxu0 %v745_v21  ;;  %531 = vmatpush1.bf16.msra.mxu1 %v789_v33  ;;  %p866_p2 = scmp.ne.s32.totalorder %s639_s11, %s865_s12  ;;  %p871_p4 = scmp.lt.s32.totalorder %s865_s12, %s865_s12 }
  0x41   :  { %493 = vmatprep.subr.bf16.mxu0 %v746_v23  ;;  %532 = vmatprep.subr.bf16.mxu1 %v793_v34 }
  0x42   :  { %p872_p5 = por %p871_p4, %p870_p3 }
  0x44   :  { %494 = vmatpush1.bf16.msra.mxu0 %v748_v26  ;;  %533 = vmatpush1.bf16.msra.mxu1 %v795_v38  ;;  %p873_p6 = pnand %p872_p5, %p866_p2 }
  0x45   :  { %495 = vmatprep.subr.bf16.mxu0 %v749_v27  ;;  %534 = vmatprep.subr.bf16.mxu1 %v799_v39 }
  0x48   :  { %496 = vmatpush1.bf16.msra.mxu0 %v751_v30  ;;  %535 = vmatpush1.bf16.msra.mxu1 %v801_v43  ;;  %v121_v30 = vsub.s32 2, %v112_v13 }
  0x49   :  { %497 = vmatprep.subr.bf16.mxu0 %v752_v31  ;;  %536 = vmatprep.subr.bf16.mxu1 %v805_v45 }
  0x4c   :  { %498 = vmatpush1.bf16.msra.mxu0 %v754_v35  ;;  %537 = vmatpush1.bf16.msra.mxu1 %v807_v48  ;;  %v122_v35 = vrot.slane %v109_v15, %v121_v30 }
  0x4d   :  { %714 = vmatprep.subr.msk.bf16.mxu0 %vm460_vm1, %v709_v36  ;;  %538 = vmatprep.subr.bf16.mxu1 %v811_v49  ;;  %v126_v36 = vrot.slane %v109_v15, %v125_v32 }
  0x50   :  { %500 = vmatpush1.bf16.msra.mxu0 %v462_v41  ;;  %539 = vmatpush1.bf16.msra.mxu1 %v813_v53  ;;  %v130_v53 = vrot.slane %v109_v15, %v129_v51 }
  0x51   :  { %561 = vmatprep.subr.bf16.mxu0 %v762_v42  ;;  %716 = vmatprep.subr.msk.bf16.mxu1 %vm460_vm1, %v711_v54 }
  0x53   :  { %512 = vmatmul.mubr.bf16.vlgmr.msra.gmra.mrb[0].mxu0 %v957_v44 }
  0x54   :  { %562 = vmatpush1.bf16.msra.mxu0 %v760_v46  ;;  %719 = vmatprep.mubr.msk.bf16.mxu0 %vm456_vm0, %v949_v14  ;;  %v113_v14 = vsub.s32 0, %v112_v13 }
  0x55   :  { %563 = vmatprep.subr.bf16.mxu0 %v768_v47  ;;  %541 = vmatpush1.bf16.msra.mxu1 %v468_v58 }
  0x56   :  { %v114_v17 = vrot.slane %v109_v15, %v113_v14 }
  0x58   :  { %564 = vmatpush1.bf16.msra.mxu0 %v766_v50  ;;  %553 = vmatmul.mubr.bf16.vlgmr.msra.gmra.mrb[0].mxu1 %v957_v44 }
  0x59   :  { %565 = vmatprep.subr.bf16.mxu0 %v774_v52  ;;  %v133_v52 = vsub.s32 5, %v112_v13 }
  0x5b   :  { %v134_v54 = vrot.slane %v109_v15, %v133_v52 }
  0x5c   :  { %566 = vmatpush1.bf16.msra.mxu0 %v772_v56 }
  0x5d   :  { %567 = vmatprep.subr.bf16.mxu0 %v780_v57 }
  0x60   :  { %568 = vmatpush1.bf16.msra.mxu0 %v778_v59 }
  0x61   :  { %569 = vmatprep.subr.bf16.mxu0 %v786_v60 }
  0x64   :  { %570 = vmatpush1.bf16.msra.mxu0 %v784_v61 }
  0x65   :  { %571 = vmatprep.subr.bf16.mxu0 %v792_v62 }
  0x68   :  { %572 = vmatpush1.bf16.msra.mxu0 %v790_v63 }
  0x69   :  { %573 = vmatprep.subr.bf16.mxu0 %v798_v0 }
  0x6c   :  { %574 = vmatpush1.bf16.msra.mxu0 %v796_v1 }
  0x6d   :  { %575 = vmatprep.subr.bf16.mxu0 %v804_v2 }
  0x70   :  { %576 = vmatpush1.bf16.msra.mxu0 %v802_v3 }
  0x71   :  { %577 = vmatprep.subr.bf16.mxu0 %v810_v4 }
  0x74   :  { %578 = vmatpush1.bf16.msra.mxu0 %v808_v5 }
  0x75   :  { %579 = vmatprep.subr.bf16.mxu0 %v816_v6 }
  0x78   :  { %580 = vmatpush1.bf16.msra.mxu0 %v814_v8 }
  0x79   :  { %718 = vmatprep.subr.msk.bf16.mxu0 %vm460_vm1, %v713_v9 }
  0x7c   :  { %582 = vmatpush1.bf16.msra.mxu0 %v474_v11 }
  0x7f   :  { %594 = vmatmul.mubr.bf16.vlgmr.msra.gmra.mrb[4].mxu0 %v957_v44 }
 0x126   :  { %v513_v19 = vpop.f32.mrb[0].mxu0 }
 0x127   :  { %v514_v20 = vadd.f32 %v513_v19, %v114_v17  ;;  %v515_v21 = vpop.f32.mrb[1].mxu0 }
 0x128   :  { %v516_v22 = vadd.f32 %v515_v21, %v118_v18  ;;  %v517_v23 = vpop.f32.mrb[2].mxu0 }
 0x129   :  { %v602_v24 = vmul.f32 0.16666667, %v514_v20  ;;  %v518_v25 = vpop.f32.mrb[3].mxu0 }
 0x12a   :  { %v603_v26 = vmul.f32 0.16666667, %v516_v22 }
 0x12b   :  { %v608_v27 = vadd.f32 0.5, %v602_v24  ;;  %v554_v37 = vpop.f32.mrb[0].mxu1 }
 0x12c   :  { %v609_v28 = vadd.f32 0.5, %v603_v26  ;;  %v555_v38 = vadd.f32 %v554_v37, %v122_v35  ;;  %v556_v39 = vpop.f32.mrb[1].mxu1 }
 0x12d   :  { %v614_v29 = vmax.f32 %v608_v27, 0.0  ;;  %v557_v40 = vadd.f32 %v556_v39, %v126_v36  ;;  %v558_v41 = vpop.f32.mrb[2].mxu1 }
 0x12e   :  { %v615_v31 = vmax.f32 %v609_v28, 0.0  ;;  %v604_v42 = vmul.f32 0.16666667, %v555_v38  ;;  %v559_v43 = vpop.f32.mrb[3].mxu1 }
 0x12f   :  { %v620_v33 = vmin.f32 %v614_v29, 1.0  ;;  %v605_v44 = vmul.f32 0.16666667, %v557_v40 }
 0x130   :  { %v621_v34 = vmin.f32 %v615_v31, 1.0  ;;  %v610_v45 = vadd.f32 0.5, %v604_v42 }
 0x131   :  { %626 = vst [vmem:[#allocation7] sm:$0xff] %v620_v33  ;;  %v611_v46 = vadd.f32 0.5, %v605_v44 }
 0x132   :  { %627 = vst [vmem:[#allocation7 + $0x8] sm:$0xff] %v621_v34  ;;  %v616_v47 = vmax.f32 %v610_v45, 0.0 }
 0x133   :  { %v617_v48 = vmax.f32 %v611_v46, 0.0 }
 0x134   :  { %v622_v49 = vmin.f32 %v616_v47, 1.0 }
 0x135   :  { %v623_v50 = vmin.f32 %v617_v48, 1.0 }
 0x136   :  { %628 = vst [vmem:[#allocation7 + $0x10] sm:$0xff] %v622_v49 }
 0x137   :  { %629 = vst [vmem:[#allocation7 + $0x18] sm:$0xff] %v623_v50 }
 0x152   :  { %v595_v55 = vpop.f32.mrb[4].mxu0 }
 0x153   :  { %v596_v56 = vadd.f32 %v595_v55, %v130_v53  ;;  %v597_v57 = vpop.f32.mrb[5].mxu0 }
 0x154   :  { %v598_v58 = vadd.f32 %v597_v57, %v134_v54  ;;  %v599_v59 = vpop.f32.mrb[6].mxu0 }
 0x155   :  { %v606_v60 = vmul.f32 0.16666667, %v596_v56  ;;  %v600_v61 = vpop.f32.mrb[7].mxu0 }
 0x156   :  { %v607_v62 = vmul.f32 0.16666667, %v598_v58 }
 0x157   :  { %v612_v63 = vadd.f32 0.5, %v606_v60 }
 0x158   :  { %v613_v0 = vadd.f32 0.5, %v607_v62 }
 0x159   :  { %v618_v1 = vmax.f32 %v612_v63, 0.0 }
 0x15a   :  { %v619_v2 = vmax.f32 %v613_v0, 0.0 }
 0x15b   :  { %v624_v3 = vmin.f32 %v618_v1, 1.0 }
 0x15c   :  { %v625_v4 = vmin.f32 %v619_v2, 1.0 }
 0x15d   :  { %630 = vst [vmem:[#allocation7 + $0x20] sm:$0xff] %v624_v3 }
 0x15e   :  { %631 = vst [vmem:[#allocation7 + $0x28] sm:$0xff] %v625_v4 }
 0x15f   :  { %876 = shalt.err (!%p873_p6)
}
 0x160   :  { %s877_s15 = scalar_lea.hbm %s986_s3, 768 }
 0x161   :  { %p878_p7 = scmp.ne.s32.totalorder %s986_s3, %s877_s15  ;;  %p881_p8 = scmp.lt.u32.totalorder %s877_s15, %s986_s3 }
 0x163   :  { %p883_p9 = pnand %p881_p8, %p878_p7 }
 0x165   :  { %886 = shalt.err (!%p883_p9)
}
 0x166   :  { %641 = dma.vmem_to_hbm [thread:$0]  %s639_s11, 768, %s986_s3, [#allocation4]  }
 0x167   :  { %891 = dma.done.wait [#allocation4], 768  }
 0x168   :  { %892 = vsyncadd [#allocation4], 4294966528 }
 0x169   :  { %645 = vsyncpa [#allocation3], 1 }
 0x16a   :  { %646 = vsyncpa [#allocation6], 1 }
 0x16b   :  { %647 = vsyncpa [#allocation4], 1 }

</bundles_post_ra>
